<compile_context>
chip_gen: v7x
topology: tpu7x:2x2x1
jax: 0.10.0
libtpu: 0.0.40
codegen_flags: <defaults>
</compile_context>

<pallas_src>
import functools

import jax
import jax.numpy as jnp
from jax.experimental import pallas as pl
from jax.experimental.pallas import tpu as pltpu

CONF = dict(
    features=list(range(32)),   # 32 input features after flatten
    encoder=[64, 48],
    latent_dims=16,
    activation="tanh",
)
BN_EPS = 1e-5

FEAT = len(CONF["features"])      # 32
LAT = CONF["latent_dims"]         # 16
PAD = 128                         # lane-padded layer width (one vreg lane block)
N_LAYERS = 6                      # enc1, enc2, heads(mu|sigma), dec0, dec1, dec2
TILE_B_MAX = 512                  # batch tile cap (VMEM-safe on v5e/v6e/v7x)


def _round_up(n, m):
    return (n + m - 1) // m * m


# ----------------------------------------------------------------------------
# Pallas kernel: entire VAE forward (encoder -> heads -> KL -> decoder)
# ----------------------------------------------------------------------------
def _vae_kernel(x_ref, w_ref, b_ref, dec_ref, z_ref, kl_ref, kl_acc,
                *, n_rows, tile_b):
    """One batch tile of the VAE forward.

    All layer widths are zero-padded to PAD=128 lanes, so every matmul is a
    lane-aligned (tile_b,128)x(128,128) MXU op and every store is a full
    128-lane vst.  The zero padding is self-consistent: padded weight rows /
    cols and biases are zero, so padded activation lanes stay exactly 0
    (tanh(0) = 0) through the whole chain.
    """

    def dense(h, i):
        # w_ref: (N_LAYERS, 128, 128) slab; b_ref: (N_LAYERS, 1, 128) slab.
        return jnp.dot(h, w_ref[i], preferred_element_type=jnp.float32) + b_ref[i]

    act = jnp.tanh

    h = x_ref[...]                          # (tile_b, 128), features in lanes 0:32

    # ---- encoder: Linear(+folded eval BatchNorm) -> tanh, x2 ----
    h = act(dense(h, 0))
    h = act(dense(h, 1))

    # ---- fused latent heads: lanes [0:16)=mu, [16:32)=sigma, rest 0 ----
    hp = dense(h, 2)

    col = jax.lax.broadcasted_iota(jnp.int32, hp.shape, 1)
    is_mu = col < LAT
    is_sig = jnp.logical_and(col >= LAT, col < 2 * LAT)
    # Mask out batch-padding rows (their biases would pollute the KL sum).
    row = jax.lax.broadcasted_iota(jnp.int32, hp.shape, 0) + pl.program_id(0) * tile_b
    valid = row < n_rows

    # ---- KL divergence: -0.5 * sum(1 + sigma - mu^2 - exp(sigma)) ----
    kl_term = (jnp.where(jnp.logical_and(is_sig, valid), 1.0 + hp - jnp.exp(hp), 0.0)
               - jnp.where(jnp.logical_and(is_mu, valid), hp * hp, 0.0))
    kl_part = -0.5 * jnp.sum(kl_term)

    @pl.when(pl.program_id(0) == 0)
    def _():
        kl_acc[0, 0] = 0.0

    kl_acc[0, 0] += kl_part

    @pl.when(pl.program_id(0) == pl.num_programs(0) - 1)
    def _():
        kl_ref[0, 0] = kl_acc[0, 0]         # scalar output stays in SMEM

    # ---- eval-mode reparameterize: z = mu (keep mu lanes, zero the rest) ----
    z = jnp.where(is_mu, hp, 0.0)
    z_ref[...] = z

    # ---- decoder: Linear -> tanh, then 2x Linear(+folded BN) -> tanh ----
    d = act(dense(z, 3))
    d = act(dense(d, 4))
    d = act(dense(d, 5))
    dec_ref[...] = d


# ----------------------------------------------------------------------------
# Parameter init (deterministic, mimicking fresh nn.Linear / nn.BatchNorm1d)
# ----------------------------------------------------------------------------
def _linear_params(key, fan_in, fan_out):
    kw, kb = jax.random.split(key)
    bound = 1.0 / float(jnp.sqrt(float(fan_in)))
    w = jax.random.uniform(kw, (fan_in, fan_out), jnp.float32, -bound, bound)
    b = jax.random.uniform(kb, (1, fan_out), jnp.float32, -bound, bound)
    return w, b


def _bn_eval_affine(num_features):
    # Freshly-initialized BatchNorm1d in eval mode:
    # gamma=1, beta=0, running_mean=0, running_var=1 -> y = x / sqrt(1 + eps)
    scale = jnp.full((1, num_features), 1.0 / jnp.sqrt(1.0 + BN_EPS), jnp.float32)
    shift = jnp.zeros((1, num_features), jnp.float32)
    return scale, shift


def init_params(key):
    """Raw, PyTorch-layout parameters (Linear W/b + BatchNorm eval scale/shift)."""
    enc_layers = [FEAT] + CONF["encoder"]    # [32, 64, 48]
    dec_layers = enc_layers[::-1]            # [48, 64, 32]
    keys = jax.random.split(key, 7)
    p = []
    # encoder: Linear + BN per layer
    for i, k in zip(range(len(enc_layers) - 1), keys[:2]):
        w, b = _linear_params(k, enc_layers[i], enc_layers[i + 1])
        s, t = _bn_eval_affine(enc_layers[i + 1])
        p += [w, b, s, t]
    # mu / sigma heads
    wmu, bmu = _linear_params(keys[2], enc_layers[-1], LAT)
    wsg, bsg = _linear_params(keys[3], enc_layers[-1], LAT)
    p += [wmu, bmu, wsg, bsg]
    # decoder input layer (latent -> dec_layers[0]), no BN
    wd0, bd0 = _linear_params(keys[4], LAT, dec_layers[0])
    p += [wd0, bd0]
    # decoder hidden layers: Linear + BN
    for i, k in zip(range(len(dec_layers) - 1), keys[5:7]):
        w, b = _linear_params(k, dec_layers[i], dec_layers[i + 1])
        s, t = _bn_eval_affine(dec_layers[i + 1])
        p += [w, b, s, t]
    return p


def pack_params(params):
    """Fold eval-BatchNorm into the preceding Linear (W' = W*s, b' = b*s + t),
    fuse the mu/sigma heads into a single matmul, zero-pad every layer to
    128x128, and stack into one weight slab + one bias slab (2 kernel inputs
    instead of 22).  Built once, outside the jit."""
    (we1, be1, se1, te1, we2, be2, se2, te2,
     wmu, bmu, wsg, bsg, wd0, bd0,
     wd1, bd1, sd1, td1, wd2, bd2, sd2, td2) = params

    layers = [
        (we1 * se1, be1 * se1 + te1),                      # encoder 1 (BN folded)
        (we2 * se2, be2 * se2 + te2),                      # encoder 2 (BN folded)
        (jnp.concatenate([wmu, wsg], axis=1),              # fused [mu | sigma] heads
         jnp.concatenate([bmu, bsg], axis=1)),
        (wd0, bd0),                                        # decoder input layer
        (wd1 * sd1, bd1 * sd1 + td1),                      # decoder 1 (BN folded)
        (wd2 * sd2, bd2 * sd2 + td2),                      # decoder 2 (BN folded)
    ]
    w_slab = jnp.zeros((N_LAYERS, PAD, PAD), jnp.float32)
    b_slab = jnp.zeros((N_LAYERS, 1, PAD), jnp.float32)
    for i, (w, b) in enumerate(layers):
        k, n = w.shape
        w_slab = w_slab.at[i, :k, :n].set(w)
        b_slab = b_slab.at[i, :, :n].set(b)
    return w_slab, b_slab


# ----------------------------------------------------------------------------
# Wrapper
# ----------------------------------------------------------------------------
@jax.jit
def vae_forward(x, w_slab, b_slab):
    """Returns (decoded, z, kl): same as VariationalAutoencoder.forward in eval
    mode (z = mu), plus the module's self.kl side-effect value."""
    B = x.shape[0]
    xf = x.reshape(B, -1).astype(jnp.float32)        # torch.flatten(x, start_dim=1)
    feat = xf.shape[1]

    tile_b = min(_round_up(B, 8), TILE_B_MAX)        # batch tile, multiple of 8
    bp = _round_up(B, tile_b)
    x_pad = jnp.zeros((bp, PAD), jnp.float32).at[:B, :feat].set(xf)

    grid = (bp // tile_b,)
    kernel = functools.partial(_vae_kernel, n_rows=B, tile_b=tile_b)

    dec_pad, z_pad, kl = pl.pallas_call(
        kernel,
        out_shape=(
            jax.ShapeDtypeStruct((bp, PAD), jnp.float32),   # decoded (lane-padded)
            jax.ShapeDtypeStruct((bp, PAD), jnp.float32),   # z (lane-padded)
            jax.ShapeDtypeStruct((1, 1), jnp.float32),      # kl (SMEM scalar)
        ),
        grid=grid,
        in_specs=[
            pl.BlockSpec((tile_b, PAD), lambda i: (i, 0)),            # x tile
            pl.BlockSpec((N_LAYERS, PAD, PAD), lambda i: (0, 0, 0)),  # weight slab
            pl.BlockSpec((N_LAYERS, 1, PAD), lambda i: (0, 0, 0)),    # bias slab
        ],
        out_specs=(
            pl.BlockSpec((tile_b, PAD), lambda i: (i, 0)),
            pl.BlockSpec((tile_b, PAD), lambda i: (i, 0)),
            pl.BlockSpec(memory_space=pltpu.MemorySpace.SMEM),
        ),
        scratch_shapes=[pltpu.SMEM((1, 1), jnp.float32)],
        compiler_params=pltpu.CompilerParams(
            # KL is reduced across batch tiles in SMEM scratch -> sequential axis.
            dimension_semantics=("arbitrary",),
        ),
    )(x_pad, w_slab, b_slab)

    return dec_pad[:B, :feat], z_pad[:B, :LAT], kl[0, 0]


# ----------------------------------------------------------------------------
# Pure-JAX reference (for correctness check)
# ----------------------------------------------------------------------------
def vae_reference(x, params):
    (we1, be1, se1, te1, we2, be2, se2, te2,
     wmu, bmu, wsg, bsg, wd0, bd0,
     wd1, bd1, sd1, td1, wd2, bd2, sd2, td2) = params
    h = x.reshape(x.shape[0], -1).astype(jnp.float32)
    h = jnp.tanh((h @ we1 + be1) * se1 + te1)
    h = jnp.tanh((h @ we2 + be2) * se2 + te2)
    mu = h @ wmu + bmu
    sigma = h @ wsg + bsg
    z = mu
    kl = -0.5 * jnp.sum(1.0 + sigma - mu * mu - jnp.exp(sigma))
    d = jnp.tanh(z @ wd0 + bd0)
    d = jnp.tanh((d @ wd1 + bd1) * sd1 + td1)
    d = jnp.tanh((d @ wd2 + bd2) * sd2 + td2)
    return d, z, kl


if __name__ == "__main__":
    key = jax.random.PRNGKey(0)
    kx, kp = jax.random.split(key)
    # x: (B, C, L) = (2, 4, 8) -> flattened to (2, 32) features
    x = jax.random.normal(kx, (2, 4, 8), jnp.float32)
    params = init_params(kp)
    w_slab, b_slab = pack_params(params)   # BN-folded, fused, padded; built once

    dec, z, kl = vae_forward(x, w_slab, b_slab)
    jax.block_until_ready((dec, z, kl))

    dec_ref, z_ref, kl_ref = vae_reference(x, params)
    assert jnp.allclose(dec, dec_ref, atol=1e-5, rtol=1e-5)
    assert jnp.allclose(z, z_ref, atol=1e-5, rtol=1e-5)
    assert jnp.allclose(kl, kl_ref, atol=1e-4, rtol=1e-4)

    print("KERNEL_OK")
</pallas_src>

<mosaic_0001>
module attributes {stable_mosaic.version = 11 : i64} {
  func.func @_vae_kernel(%arg0: i32, %arg1: memref<8x128xf32, #tpu.memory_space<vmem>>, %arg2: memref<6x128x128xf32, #tpu.memory_space<vmem>>, %arg3: memref<6x1x128xf32, #tpu.memory_space<vmem>>, %arg4: memref<8x128xf32, #tpu.memory_space<vmem>>, %arg5: memref<8x128xf32, #tpu.memory_space<vmem>>, %arg6: memref<1x1xf32, #tpu.memory_space<smem>>, %arg7: memref<1x1xf32, #tpu.memory_space<smem>>) attributes {dimension_semantics = [#tpu.dimension_semantics<arbitrary>], iteration_bounds = array<i64: 1>, scalar_prefetch = 0 : i64, scratch_operands = 1 : i64, tpu.core_type = #tpu.core_type<tc>, window_params = [{transform_indices = @transform_0, window_bounds = array<i64: 8, 128>}, {pipeline_mode = #tpu.pipeline_mode<synchronous>, transform_indices = @transform_1, window_bounds = array<i64: 6, 128, 128>}, {pipeline_mode = #tpu.pipeline_mode<synchronous>, transform_indices = @transform_2, window_bounds = array<i64: 6, 1, 128>}, {transform_indices = @transform_3, window_bounds = array<i64: 8, 128>}, {transform_indices = @transform_4, window_bounds = array<i64: 8, 128>}, {transform_indices = @transform_5, window_bounds = array<i64: 1, 1>}]} {
    %c0 = arith.constant 0 : index
    %c0_0 = arith.constant 0 : index
    %0 = vector.load %arg1[%c0, %c0_0] : memref<8x128xf32, #tpu.memory_space<vmem>>, vector<8x128xf32>
    %c0_1 = arith.constant 0 : index
    %c0_2 = arith.constant 0 : index
    %c0_3 = arith.constant 0 : index
    %1 = vector.load %arg2[%c0_1, %c0_2, %c0_3] : memref<6x128x128xf32, #tpu.memory_space<vmem>>, vector<1x128x128xf32>
    %2 = vector.shape_cast %1 : vector<1x128x128xf32> to vector<128x128xf32>
    %cst = arith.constant dense<0.000000e+00> : vector<8x128xf32>
    %3 = tpu.matmul %0, %2, %cst {dimension_numbers = #tpu.dot_dimension_numbers<[1], [0], [0], [1], [0, 0, 1, 1], [], []>} : vector<8x128xf32>, vector<128x128xf32>, vector<8x128xf32> -> vector<8x128xf32>
    %c0_4 = arith.constant 0 : index
    %c0_5 = arith.constant 0 : index
    %c0_6 = arith.constant 0 : index
    %4 = vector.load %arg3[%c0_4, %c0_5, %c0_6] : memref<6x1x128xf32, #tpu.memory_space<vmem>>, vector<1x1x128xf32>
    %5 = vector.shape_cast %4 : vector<1x1x128xf32> to vector<1x128xf32>
    %6 = vector.broadcast %5 : vector<1x128xf32> to vector<8x128xf32>
    %7 = arith.addf %3, %6 : vector<8x128xf32>
    %8 = math.tanh %7 : vector<8x128xf32>
    %c1 = arith.constant 1 : index
    %c0_7 = arith.constant 0 : index
    %c0_8 = arith.constant 0 : index
    %9 = vector.load %arg2[%c1, %c0_7, %c0_8] : memref<6x128x128xf32, #tpu.memory_space<vmem>>, vector<1x128x128xf32>
    %10 = vector.shape_cast %9 : vector<1x128x128xf32> to vector<128x128xf32>
    %cst_9 = arith.constant dense<0.000000e+00> : vector<8x128xf32>
    %11 = tpu.matmul %8, %10, %cst_9 {dimension_numbers = #tpu.dot_dimension_numbers<[1], [0], [0], [1], [0, 0, 1, 1], [], []>} : vector<8x128xf32>, vector<128x128xf32>, vector<8x128xf32> -> vector<8x128xf32>
    %c1_10 = arith.constant 1 : index
    %c0_11 = arith.constant 0 : index
    %c0_12 = arith.constant 0 : index
    %12 = vector.load %arg3[%c1_10, %c0_11, %c0_12] : memref<6x1x128xf32, #tpu.memory_space<vmem>>, vector<1x1x128xf32>
    %13 = vector.shape_cast %12 : vector<1x1x128xf32> to vector<1x128xf32>
    %14 = vector.broadcast %13 : vector<1x128xf32> to vector<8x128xf32>
    %15 = arith.addf %11, %14 : vector<8x128xf32>
    %16 = math.tanh %15 : vector<8x128xf32>
    %c2 = arith.constant 2 : index
    %c0_13 = arith.constant 0 : index
    %c0_14 = arith.constant 0 : index
    %17 = vector.load %arg2[%c2, %c0_13, %c0_14] : memref<6x128x128xf32, #tpu.memory_space<vmem>>, vector<1x128x128xf32>
    %18 = vector.shape_cast %17 : vector<1x128x128xf32> to vector<128x128xf32>
    %cst_15 = arith.constant dense<0.000000e+00> : vector<8x128xf32>
    %19 = tpu.matmul %16, %18, %cst_15 {dimension_numbers = #tpu.dot_dimension_numbers<[1], [0], [0], [1], [0, 0, 1, 1], [], []>} : vector<8x128xf32>, vector<128x128xf32>, vector<8x128xf32> -> vector<8x128xf32>
    %c2_16 = arith.constant 2 : index
    %c0_17 = arith.constant 0 : index
    %c0_18 = arith.constant 0 : index
    %20 = vector.load %arg3[%c2_16, %c0_17, %c0_18] : memref<6x1x128xf32, #tpu.memory_space<vmem>>, vector<1x1x128xf32>
    %21 = vector.shape_cast %20 : vector<1x1x128xf32> to vector<1x128xf32>
    %22 = vector.broadcast %21 : vector<1x128xf32> to vector<8x128xf32>
    %23 = arith.addf %19, %22 : vector<8x128xf32>
    %24 = tpu.iota {dimensions = array<i32: 1>} : vector<8x128xi32>
    %c16_i32 = arith.constant 16 : i32
    %25 = vector.broadcast %c16_i32 : i32 to vector<8x128xi32>
    %26 = arith.cmpi slt, %24, %25 : vector<8x128xi32>
    %c16_i32_19 = arith.constant 16 : i32
    %27 = vector.broadcast %c16_i32_19 : i32 to vector<8x128xi32>
    %28 = arith.cmpi sge, %24, %27 : vector<8x128xi32>
    %c32_i32 = arith.constant 32 : i32
    %29 = vector.broadcast %c32_i32 : i32 to vector<8x128xi32>
    %30 = arith.cmpi slt, %24, %29 : vector<8x128xi32>
    %31 = arith.andi %28, %30 : vector<8x128xi1>
    %32 = tpu.iota {dimensions = array<i32: 0>} : vector<8x128xi32>
    %c8_i32 = arith.constant 8 : i32
    %33 = arith.muli %arg0, %c8_i32 : i32
    %34 = vector.broadcast %33 : i32 to vector<8x128xi32>
    %35 = arith.addi %32, %34 : vector<8x128xi32>
    %c2_i32 = arith.constant 2 : i32
    %36 = vector.broadcast %c2_i32 : i32 to vector<8x128xi32>
    %37 = arith.cmpi slt, %35, %36 : vector<8x128xi32>
    %38 = arith.andi %31, %37 : vector<8x128xi1>
    %cst_20 = arith.constant 1.000000e+00 : f32
    %39 = vector.broadcast %cst_20 : f32 to vector<8x128xf32>
    %40 = arith.addf %39, %23 : vector<8x128xf32>
    %41 = math.exp %23 : vector<8x128xf32>
    %42 = arith.subf %40, %41 : vector<8x128xf32>
    %cst_21 = arith.constant 0.000000e+00 : f32
    %43 = vector.broadcast %cst_21 : f32 to vector<8x128xf32>
    %44 = arith.select %38, %42, %43 : vector<8x128xi1>, vector<8x128xf32>
    %45 = arith.andi %26, %37 : vector<8x128xi1>
    %46 = arith.mulf %23, %23 : vector<8x128xf32>
    %cst_22 = arith.constant 0.000000e+00 : f32
    %47 = vector.broadcast %cst_22 : f32 to vector<8x128xf32>
    %48 = arith.select %45, %46, %47 : vector<8x128xi1>, vector<8x128xf32>
    %49 = arith.subf %44, %48 : vector<8x128xf32>
    %50 = vector.shape_cast %49 : vector<8x128xf32> to vector<1x8x128xf32>
    %cst_23 = arith.constant dense<0.000000e+00> : vector<1xf32>
    %51 = vector.multi_reduction <add>, %50, %cst_23 [1, 2] : vector<1x8x128xf32> to vector<1xf32>
    %52 = vector.shape_cast %51 : vector<1xf32> to vector<1x1x1xf32>
    %53 = vector.extract %52[0, 0, 0] : f32 from vector<1x1x1xf32>
    %cst_24 = arith.constant -5.000000e-01 : f32
    %54 = arith.mulf %cst_24, %53 : f32
    %c0_i32 = arith.constant 0 : i32
    %55 = arith.cmpi eq, %arg0, %c0_i32 : i32
    %56 = arith.extui %55 : i1 to i32
    %c0_i32_25 = arith.constant 0 : i32
    %57 = arith.cmpi ne, %56, %c0_i32_25 : i32
    scf.if %57 {
      %cst_55 = arith.constant 0.000000e+00 : f32
      %c0_56 = arith.constant 0 : index
      %c0_57 = arith.constant 0 : index
      %92 = memref.load %arg7[%c0_56, %c0_57] : memref<1x1xf32, #tpu.memory_space<smem>>
      memref.store %cst_55, %arg7[%c0_56, %c0_57] : memref<1x1xf32, #tpu.memory_space<smem>>
    } else {
    }
    %c0_26 = arith.constant 0 : index
    %c0_27 = arith.constant 0 : index
    %58 = memref.load %arg7[%c0_26, %c0_27] : memref<1x1xf32, #tpu.memory_space<smem>>
    %59 = arith.addf %58, %54 : f32
    %c0_28 = arith.constant 0 : index
    %c0_29 = arith.constant 0 : index
    %60 = memref.load %arg7[%c0_28, %c0_29] : memref<1x1xf32, #tpu.memory_space<smem>>
    memref.store %59, %arg7[%c0_28, %c0_29] : memref<1x1xf32, #tpu.memory_space<smem>>
    %c0_i32_30 = arith.constant 0 : i32
    %61 = arith.cmpi eq, %arg0, %c0_i32_30 : i32
    %62 = arith.extui %61 : i1 to i32
    %c0_i32_31 = arith.constant 0 : i32
    %63 = arith.cmpi ne, %62, %c0_i32_31 : i32
    scf.if %63 {
      %c0_55 = arith.constant 0 : index
      %c0_56 = arith.constant 0 : index
      %92 = memref.load %arg7[%c0_55, %c0_56] : memref<1x1xf32, #tpu.memory_space<smem>>
      %c0_57 = arith.constant 0 : index
      %c0_58 = arith.constant 0 : index
      %93 = memref.load %arg6[%c0_57, %c0_58] : memref<1x1xf32, #tpu.memory_space<smem>>
      memref.store %92, %arg6[%c0_57, %c0_58] : memref<1x1xf32, #tpu.memory_space<smem>>
    } else {
    }
    %cst_32 = arith.constant 0.000000e+00 : f32
    %64 = vector.broadcast %cst_32 : f32 to vector<8x128xf32>
    %65 = arith.select %26, %23, %64 : vector<8x128xi1>, vector<8x128xf32>
    %c0_33 = arith.constant 0 : index
    %c0_34 = arith.constant 0 : index
    %66 = vector.load %arg5[%c0_33, %c0_34] : memref<8x128xf32, #tpu.memory_space<vmem>>, vector<8x128xf32>
    tpu.vector_store %arg5[%c0_33, %c0_34], %65 {strides = array<i32>} : memref<8x128xf32, #tpu.memory_space<vmem>>, vector<8x128xf32>,
    %c3 = arith.constant 3 : index
    %c0_35 = arith.constant 0 : index
    %c0_36 = arith.constant 0 : index
    %67 = vector.load %arg2[%c3, %c0_35, %c0_36] : memref<6x128x128xf32, #tpu.memory_space<vmem>>, vector<1x128x128xf32>
    %68 = vector.shape_cast %67 : vector<1x128x128xf32> to vector<128x128xf32>
    %cst_37 = arith.constant dense<0.000000e+00> : vector<8x128xf32>
    %69 = tpu.matmul %65, %68, %cst_37 {dimension_numbers = #tpu.dot_dimension_numbers<[1], [0], [0], [1], [0, 0, 1, 1], [], []>} : vector<8x128xf32>, vector<128x128xf32>, vector<8x128xf32> -> vector<8x128xf32>
    %c3_38 = arith.constant 3 : index
    %c0_39 = arith.constant 0 : index
    %c0_40 = arith.constant 0 : index
    %70 = vector.load %arg3[%c3_38, %c0_39, %c0_40] : memref<6x1x128xf32, #tpu.memory_space<vmem>>, vector<1x1x128xf32>
    %71 = vector.shape_cast %70 : vector<1x1x128xf32> to vector<1x128xf32>
    %72 = vector.broadcast %71 : vector<1x128xf32> to vector<8x128xf32>
    %73 = arith.addf %69, %72 : vector<8x128xf32>
    %74 = math.tanh %73 : vector<8x128xf32>
    %c4 = arith.constant 4 : index
    %c0_41 = arith.constant 0 : index
    %c0_42 = arith.constant 0 : index
    %75 = vector.load %arg2[%c4, %c0_41, %c0_42] : memref<6x128x128xf32, #tpu.memory_space<vmem>>, vector<1x128x128xf32>
    %76 = vector.shape_cast %75 : vector<1x128x128xf32> to vector<128x128xf32>
    %cst_43 = arith.constant dense<0.000000e+00> : vector<8x128xf32>
    %77 = tpu.matmul %74, %76, %cst_43 {dimension_numbers = #tpu.dot_dimension_numbers<[1], [0], [0], [1], [0, 0, 1, 1], [], []>} : vector<8x128xf32>, vector<128x128xf32>, vector<8x128xf32> -> vector<8x128xf32>
    %c4_44 = arith.constant 4 : index
    %c0_45 = arith.constant 0 : index
    %c0_46 = arith.constant 0 : index
    %78 = vector.load %arg3[%c4_44, %c0_45, %c0_46] : memref<6x1x128xf32, #tpu.memory_space<vmem>>, vector<1x1x128xf32>
    %79 = vector.shape_cast %78 : vector<1x1x128xf32> to vector<1x128xf32>
    %80 = vector.broadcast %79 : vector<1x128xf32> to vector<8x128xf32>
    %81 = arith.addf %77, %80 : vector<8x128xf32>
    %82 = math.tanh %81 : vector<8x128xf32>
    %c5 = arith.constant 5 : index
    %c0_47 = arith.constant 0 : index
    %c0_48 = arith.constant 0 : index
    %83 = vector.load %arg2[%c5, %c0_47, %c0_48] : memref<6x128x128xf32, #tpu.memory_space<vmem>>, vector<1x128x128xf32>
    %84 = vector.shape_cast %83 : vector<1x128x128xf32> to vector<128x128xf32>
    %cst_49 = arith.constant dense<0.000000e+00> : vector<8x128xf32>
    %85 = tpu.matmul %82, %84, %cst_49 {dimension_numbers = #tpu.dot_dimension_numbers<[1], [0], [0], [1], [0, 0, 1, 1], [], []>} : vector<8x128xf32>, vector<128x128xf32>, vector<8x128xf32> -> vector<8x128xf32>
    %c5_50 = arith.constant 5 : index
    %c0_51 = arith.constant 0 : index
    %c0_52 = arith.constant 0 : index
    %86 = vector.load %arg3[%c5_50, %c0_51, %c0_52] : memref<6x1x128xf32, #tpu.memory_space<vmem>>, vector<1x1x128xf32>
    %87 = vector.shape_cast %86 : vector<1x1x128xf32> to vector<1x128xf32>
    %88 = vector.broadcast %87 : vector<1x128xf32> to vector<8x128xf32>
    %89 = arith.addf %85, %88 : vector<8x128xf32>
    %90 = math.tanh %89 : vector<8x128xf32>
    %c0_53 = arith.constant 0 : index
    %c0_54 = arith.constant 0 : index
    %91 = vector.load %arg4[%c0_53, %c0_54] : memref<8x128xf32, #tpu.memory_space<vmem>>, vector<8x128xf32>
    tpu.vector_store %arg4[%c0_53, %c0_54], %90 {strides = array<i32>} : memref<8x128xf32, #tpu.memory_space<vmem>>, vector<8x128xf32>,
    return
  }
  func.func @transform_0(%arg0: i32) -> (i32, i32) {
    %c0_i32 = arith.constant 0 : i32
    %c0_i32_0 = arith.constant 0 : i32
    return %arg0, %c0_i32 : i32, i32
  }
  func.func @transform_1(%arg0: i32) -> (i32, i32, i32) {
    %c0_i32 = arith.constant 0 : i32
    %c0_i32_0 = arith.constant 0 : i32
    %c0_i32_1 = arith.constant 0 : i32
    %c0_i32_2 = arith.constant 0 : i32
    return %c0_i32, %c0_i32_0, %c0_i32_1 : i32, i32, i32
  }
  func.func @transform_2(%arg0: i32) -> (i32, i32, i32) {
    %c0_i32 = arith.constant 0 : i32
    %c0_i32_0 = arith.constant 0 : i32
    %c0_i32_1 = arith.constant 0 : i32
    %c0_i32_2 = arith.constant 0 : i32
    return %c0_i32, %c0_i32_0, %c0_i32_1 : i32, i32, i32
  }
  func.func @transform_3(%arg0: i32) -> (i32, i32) {
    %c0_i32 = arith.constant 0 : i32
    %c0_i32_0 = arith.constant 0 : i32
    return %arg0, %c0_i32 : i32, i32
  }
  func.func @transform_4(%arg0: i32) -> (i32, i32) {
    %c0_i32 = arith.constant 0 : i32
    %c0_i32_0 = arith.constant 0 : i32
    return %arg0, %c0_i32 : i32, i32
  }
  func.func @transform_5(%arg0: i32) -> (i32, i32) {
    %c0_i32 = arith.constant 0 : i32
    %c0_i32_0 = arith.constant 0 : i32
    %c0_i32_1 = arith.constant 0 : i32
    return %c0_i32, %c0_i32_0 : i32, i32
  }
}

</mosaic_0001>

<bundles_post_ra>
// kernel: vae_forward.1
= control target key start
LH: loop header
LB: loop body
LE: loop exit
PB: predicated region body
PF: predicated region fallthrough
CT: control target
= control target key end

     0   :  { %11 = vsyncpa [#allocation4], 0  ;;  %s1355_s0 = inlined_call_operand.vmem [shape: f32[8,128], index: 0, kind: input, shape index: {}]   ;;  %s1356_s1 = inlined_call_operand.hbm [shape: f32[6,128,128], index: 1, kind: input, shape index: {}]   ;;  %s1357_s2 = inlined_call_operand.vmem [shape: f32[6,1,128], index: 2, kind: input, shape index: {}]   ;;  %s1358_s3 = inlined_call_operand.vmem [shape: f32[8,128], index: 3, kind: output, shape index: {0}]   ;;  %s1359_s4 = inlined_call_operand.vmem [shape: f32[8,128], index: 4, kind: output, shape index: {1}]   ;;  %s1360_s5 = inlined_call_operand.hbm [shape: f32[1,1], index: 5, kind: output, shape index: {2}]  }
   0x1   :  { %12 = vsyncpa [#allocation5], 0  ;;  %s1204_s18 = smov [#allocation3]   ;;  %s1168_s22 = scalar_lea.hbm %s1356_s1, 12288 }
   0x2   :  { %s20_s19 = sshll.u32 %s1204_s18, 4  ;;  %p1169_p0 = scmp.ne.s32.totalorder %s1356_s1, %s1168_s22  ;;  %s21_s19 = int_to_ptr.vmem [resolvable:$true] %s20_s19 }
   0x3   :  { %p1172_p1 = scmp.lt.u32.totalorder %s1168_s22, %s1356_s1 }
   0x5   :  { %p1174_p2 = pnand %p1172_p1, %p1169_p0 }
   0x7   :  { %1177 = shalt.err (!%p1174_p2)
}
   0x8   :  { %s1178_s27 = scalar_lea.vmem %s21_s19, 12288  ;;  %p1183_p4 = scmp.lt.s32.totalorder %s21_s19, %s21_s19 }
   0x9   :  { %p1179_p3 = scmp.ne.s32.totalorder %s21_s19, %s1178_s27  ;;  %p1184_p5 = scmp.lt.s32.totalorder %s1178_s27, %s1178_s27 }
   0xb   :  { %p1185_p6 = por %p1184_p5, %p1183_p4 }
   0xd   :  { %p1186_p7 = pnand %p1185_p6, %p1179_p3 }
   0xf   :  { %1189 = shalt.err (!%p1186_p7)
}
  0x10   :  { %s1205_s28 = smov 128   ;;  %s1206_s29 = smov 8  }
  0x11   :  { %26 = dma.hbm_to_vmem [thread:$0]  %s1356_s1, 12288, %s21_s19, [#allocation4], %s1205_s28, %s1205_s28, %s1206_s29  }
  0x12   :  { %1200 = dma.done.wait [#allocation4], 12288  }
  0x13   :  { %1201 = vsyncadd [#allocation4], 4294955008  ;;  %v1207_v0 = vmov 0.0|0.0   ;;  %vm1208_vm0 = vmmov 0   ;;  %v1209_v1 = vmov 0.0   ;;  %v33_v2 = vld [vmem:[#allocation3] sm:$0xff] }
  0x14   :  { %1003 = vmatprep.subr.bf16.mxu0 %v1207_v0  ;;  %825 = vmatprep.mubr.msk.f32.mxu0 %vm1208_vm0, %v1209_v1  ;;  %v34_v3 = vld [vmem:[#allocation3 + $0x8] sm:$0xff]  ;;  %v35_v4 = vld [vmem:[#allocation3 + $0x10] sm:$0xff]  ;;  %v36_v6 = vld [vmem:[#allocation3 + $0x18] sm:$0xff]  ;;  %s1190_s22 = scalar_lea.hbm %s1360_s5, 16 }
  0x15   :  { %1027 = vmatprep.subr.bf16.mxu1 %v1207_v0  ;;  %860 = vmatprep.mubr.msk.f32.mxu1 %vm1208_vm0, %v1209_v1  ;;  %v1004_v5 = vpack.c.bf16 %v34_v3, %v33_v2  ;;  %v1007_v7 = vpack.c.bf16 %v36_v6, %v35_v4  ;;  %v37_v8 = vld [vmem:[#allocation3 + $0x20] sm:$0xff]  ;;  %v38_v9 = vld [vmem:[#allocation3 + $0x28] sm:$0xff]  ;;  %v130_v12 = vld [vmem:[#allocation3 + $0x90] sm:$0xff]  ;;  %p1191_p8 = scmp.ne.s32.totalorder %s1360_s5, %s1190_s22  ;;  %p1194_p9 = scmp.lt.u32.totalorder %s1190_s22, %s1360_s5 }
  0x16   :  { %v128_v10 = vld [vmem:[#allocation3 + $0x80] sm:$0xff]  ;;  %v129_v11 = vld [vmem:[#allocation3 + $0x88] sm:$0xff]  ;;  %v131_v13 = vld [vmem:[#allocation3 + $0x98] sm:$0xff]  ;;  %v1010_v14 = vpack.c.bf16 %v38_v9, %v37_v8 }
  0x17   :  { %1005 = vmatpush3.bf16.msra.mxu0 %v1004_v5  ;;  %v1028_v15 = vpack.c.bf16 %v129_v11, %v128_v10  ;;  %v39_v16 = vld [vmem:[#allocation3 + $0x30] sm:$0xff]  ;;  %v40_v17 = vld [vmem:[#allocation3 + $0x38] sm:$0xff]  ;;  %v1031_v18 = vpack.c.bf16 %v131_v13, %v130_v12  ;;  %v132_v19 = vld [vmem:[#allocation3 + $0xa0] sm:$0xff]  ;;  %p1196_p10 = pnand %p1194_p9, %p1191_p8 }
  0x18   :  { %1006 = vmatprep.subr.bf16.mxu0 %v1207_v0  ;;  %v133_v20 = vld [vmem:[#allocation3 + $0xa8] sm:$0xff]  ;;  %v1013_v21 = vpack.c.bf16 %v40_v17, %v39_v16  ;;  %v41_v22 = vld [vmem:[#allocation3 + $0x40] sm:$0xff]  ;;  %v134_v25 = vld [vmem:[#allocation3 + $0xb0] sm:$0xff] }
  0x19   :  { %1029 = vmatpush3.bf16.msra.mxu1 %v1028_v15  ;;  %v42_v23 = vld [vmem:[#allocation3 + $0x48] sm:$0xff]  ;;  %v1034_v24 = vpack.c.bf16 %v133_v20, %v132_v19  ;;  %v135_v26 = vld [vmem:[#allocation3 + $0xb8] sm:$0xff]  ;;  %v43_v28 = vld [vmem:[#allocation3 + $0x50] sm:$0xff] }
  0x1a   :  { %1030 = vmatprep.subr.bf16.mxu1 %v1207_v0  ;;  %v1016_v27 = vpack.c.bf16 %v42_v23, %v41_v22  ;;  %v44_v29 = vld [vmem:[#allocation3 + $0x58] sm:$0xff]  ;;  %v1037_v30 = vpack.c.bf16 %v135_v26, %v134_v25  ;;  %v136_v31 = vld [vmem:[#allocation3 + $0xc0] sm:$0xff]  ;;  %v137_v32 = vld [vmem:[#allocation3 + $0xc8] sm:$0xff] }
  0x1b   :  { %1008 = vmatpush3.bf16.msra.mxu0 %v1007_v7  ;;  %v1019_v33 = vpack.c.bf16 %v44_v29, %v43_v28  ;;  %v45_v34 = vld [vmem:[#allocation3 + $0x60] sm:$0xff]  ;;  %v46_v35 = vld [vmem:[#allocation3 + $0x68] sm:$0xff]  ;;  %v1040_v36 = vpack.c.bf16 %v137_v32, %v136_v31  ;;  %v47_v38 = vld [vmem:[#allocation3 + $0x70] sm:$0xff] }
  0x1c   :  { %1009 = vmatprep.subr.bf16.mxu0 %v1207_v0  ;;  %v1022_v37 = vpack.c.bf16 %v46_v35, %v45_v34  ;;  %v48_v39 = vld [vmem:[#allocation3 + $0x78] sm:$0xff]  ;;  %v32_v41 = vld [vmem:[%s1355_s0] sm:$0xff]  ;;  %v138_v42 = vld [vmem:[#allocation3 + $0xd0] sm:$0xff] }
  0x1d   :  { %1032 = vmatpush3.bf16.msra.mxu1 %v1031_v18  ;;  %v1025_v40 = vpack.c.bf16 %v48_v39, %v47_v38  ;;  %v139_v43 = vld [vmem:[#allocation3 + $0xd8] sm:$0xff]  ;;  %v140_v45 = vld [vmem:[#allocation3 + $0xe0] sm:$0xff]  ;;  %v141_v46 = vld [vmem:[#allocation3 + $0xe8] sm:$0xff] }
  0x1e   :  { %1033 = vmatprep.subr.bf16.mxu1 %v1207_v0  ;;  %v1043_v44 = vpack.c.bf16 %v139_v43, %v138_v42  ;;  %v1046_v47 = vpack.c.bf16 %v141_v46, %v140_v45  ;;  %v142_v48 = vld [vmem:[#allocation3 + $0xf0] sm:$0xff]  ;;  %v143_v49 = vld [vmem:[#allocation3 + $0xf8] sm:$0xff]  ;;  %v224_v51 = vld [vmem:[#allocation3 + $0x100] sm:$0xff] }
  0x1f   :  { %1011 = vmatpush3.bf16.msra.mxu0 %v1010_v14  ;;  %v1049_v50 = vpack.c.bf16 %v143_v49, %v142_v48  ;;  %v225_v52 = vld [vmem:[#allocation3 + $0x108] sm:$0xff]  ;;  %v226_v53 = vld [vmem:[#allocation3 + $0x110] sm:$0xff]  ;;  %v227_v55 = vld [vmem:[#allocation3 + $0x118] sm:$0xff] }
  0x20   :  { %1012 = vmatprep.subr.bf16.mxu0 %v1207_v0  ;;  %v1052_v54 = vpack.c.bf16 %v225_v52, %v224_v51  ;;  %v1055_v56 = vpack.c.bf16 %v227_v55, %v226_v53  ;;  %v228_v57 = vld [vmem:[#allocation3 + $0x120] sm:$0xff]  ;;  %v229_v58 = vld [vmem:[#allocation3 + $0x128] sm:$0xff]  ;;  %v230_v60 = vld [vmem:[#allocation3 + $0x130] sm:$0xff] }
  0x21   :  { %1035 = vmatpush3.bf16.msra.mxu1 %v1034_v24  ;;  %v1058_v59 = vpack.c.bf16 %v229_v58, %v228_v57  ;;  %v231_v61 = vld [vmem:[#allocation3 + $0x138] sm:$0xff]  ;;  %v232_v63 = vld [vmem:[#allocation3 + $0x140] sm:$0xff]  ;;  %v233_v2 = vld [vmem:[#allocation3 + $0x148] sm:$0xff] }
  0x22   :  { %1036 = vmatprep.subr.bf16.mxu1 %v1207_v0  ;;  %v1061_v62 = vpack.c.bf16 %v231_v61, %v230_v60  ;;  %v1064_v3 = vpack.c.bf16 %v233_v2, %v232_v63  ;;  %v679_v4 = vld [vmem:[%s1357_s2] ss:$0 sm:$0xff]  ;;  %v234_v9 = vld [vmem:[#allocation3 + $0x150] sm:$0xff]  ;;  %v235_v10 = vld [vmem:[#allocation3 + $0x158] sm:$0xff] }
  0x23   :  { %1014 = vmatpush3.bf16.msra.mxu0 %v1013_v21  ;;  %v1067_v11 = vpack.c.bf16 %v235_v10, %v234_v9  ;;  %v236_v12 = vld [vmem:[#allocation3 + $0x160] sm:$0xff]  ;;  %v237_v13 = vld [vmem:[#allocation3 + $0x168] sm:$0xff]  ;;  %v238_v15 = vld [vmem:[#allocation3 + $0x170] sm:$0xff] }
  0x24   :  { %1015 = vmatprep.subr.bf16.mxu0 %v1207_v0  ;;  %v1070_v14 = vpack.c.bf16 %v237_v13, %v236_v12  ;;  %v239_v16 = vld [vmem:[#allocation3 + $0x178] sm:$0xff]  ;;  %v369_v18 = vld [vmem:[#allocation3 + $0x180] sm:$0xff]  ;;  %v370_v19 = vld [vmem:[#allocation3 + $0x188] sm:$0xff] }
  0x25   :  { %1038 = vmatpush3.bf16.msra.mxu1 %v1037_v30  ;;  %v1073_v17 = vpack.c.bf16 %v239_v16, %v238_v15  ;;  %v371_v20 = vld [vmem:[#allocation3 + $0x190] sm:$0xff]  ;;  %v1076_v21 = vpack.c.bf16 %v370_v19, %v369_v18  ;;  %v372_v22 = vld [vmem:[#allocation3 + $0x198] sm:$0xff]  ;;  %v373_v24 = vld [vmem:[#allocation3 + $0x1a0] sm:$0xff] }
  0x26   :  { %1039 = vmatprep.subr.bf16.mxu1 %v1207_v0  ;;  %v1079_v23 = vpack.c.bf16 %v372_v22, %v371_v20  ;;  %v374_v25 = vld [vmem:[#allocation3 + $0x1a8] sm:$0xff]  ;;  %v376_v28 = vld [vmem:[#allocation3 + $0x1b8] sm:$0xff]  ;;  %v377_v30 = vld [vmem:[#allocation3 + $0x1c0] sm:$0xff] }
  0x27   :  { %1017 = vmatpush3.bf16.msra.mxu0 %v1016_v27  ;;  %v1082_v26 = vpack.c.bf16 %v374_v25, %v373_v24  ;;  %v375_v27 = vld [vmem:[#allocation3 + $0x1b0] sm:$0xff]  ;;  %v378_v31 = vld [vmem:[#allocation3 + $0x1c8] sm:$0xff]  ;;  %v380_v34 = vld [vmem:[#allocation3 + $0x1d8] sm:$0xff] }
  0x28   :  { %1018 = vmatprep.subr.bf16.mxu0 %v1207_v0  ;;  %v1085_v29 = vpack.c.bf16 %v376_v28, %v375_v27  ;;  %v1088_v32 = vpack.c.bf16 %v378_v31, %v377_v30  ;;  %v681_v39 = vld [vmem:[%s1357_s2 + $0x1] ss:$0 sm:$0xff]  ;;  %v384_v45 = vld [vmem:[#allocation3 + $0x1f8] sm:$0xff]  ;;  %v683_v49 = vld [vmem:[%s1357_s2 + $0x2] ss:$0 sm:$0xff] }
  0x29   :  { %1041 = vmatpush3.bf16.msra.mxu1 %v1040_v36  ;;  %v381_v36 = vld [vmem:[#allocation3 + $0x1e0] sm:$0xff]  ;;  %v466_v2 = vld [vmem:[#allocation3 + $0x208] sm:$0xff]  ;;  %v471_v9 = vld [vmem:[#allocation3 + $0x230] sm:$0xff] }
  0x2a   :  { %1042 = vmatprep.subr.bf16.mxu1 %v1207_v0  ;;  %v465_v63 = vld [vmem:[#allocation3 + $0x200] sm:$0xff]  ;;  %v472_v10 = vld [vmem:[#allocation3 + $0x238] sm:$0xff]  ;;  %v474_v13 = vld [vmem:[#allocation3 + $0x248] sm:$0xff] }
  0x2b   :  { %1020 = vmatpush3.bf16.msra.mxu0 %v1019_v33  ;;  %v379_v33 = vld [vmem:[#allocation3 + $0x1d0] sm:$0xff]  ;;  %v473_v12 = vld [vmem:[#allocation3 + $0x240] sm:$0xff]  ;;  %v476_v16 = vld [vmem:[#allocation3 + $0x258] sm:$0xff] }
  0x2c   :  { %1021 = vmatprep.subr.bf16.mxu0 %v1207_v0  ;;  %v1091_v35 = vpack.c.bf16 %v380_v34, %v379_v33  ;;  %v475_v15 = vld [vmem:[#allocation3 + $0x250] sm:$0xff]  ;;  %v477_v18 = vld [vmem:[#allocation3 + $0x260] sm:$0xff]  ;;  %v478_v19 = vld [vmem:[#allocation3 + $0x268] sm:$0xff] }
  0x2d   :  { %1044 = vmatpush3.bf16.msra.mxu1 %v1043_v44  ;;  %v383_v44 = vld [vmem:[#allocation3 + $0x1f0] sm:$0xff]  ;;  %v1118_v20 = vpack.c.bf16 %v478_v19, %v477_v18  ;;  %v480_v22 = vld [vmem:[#allocation3 + $0x278] sm:$0xff]  ;;  %v561_v24 = vld [vmem:[#allocation3 + $0x280] sm:$0xff] }
  0x2e   :  { %1045 = vmatprep.subr.bf16.mxu1 %v1207_v0  ;;  %v1097_v46 = vpack.c.bf16 %v384_v45, %v383_v44  ;;  %v562_v25 = vld [vmem:[#allocation3 + $0x288] sm:$0xff]  ;;  %v564_v28 = vld [vmem:[#allocation3 + $0x298] sm:$0xff]  ;;  %v565_v30 = vld [vmem:[#allocation3 + $0x2a0] sm:$0xff] }
  0x2f   :  { %1023 = vmatpush3.bf16.msra.mxu0 %v1022_v37  ;;  %v382_v37 = vld [vmem:[#allocation3 + $0x1e8] sm:$0xff]  ;;  %v1124_v27 = vpack.c.bf16 %v562_v25, %v561_v24  ;;  %v567_v33 = vld [vmem:[#allocation3 + $0x2b0] sm:$0xff]  ;;  %v568_v34 = vld [vmem:[#allocation3 + $0x2b8] sm:$0xff] }
  0x30   :  { %1024 = vmatprep.subr.bf16.mxu0 %v1207_v0  ;;  %v1094_v38 = vpack.c.bf16 %v382_v37, %v381_v36  ;;  %v566_v31 = vld [vmem:[#allocation3 + $0x2a8] sm:$0xff]  ;;  %v569_v36 = vld [vmem:[#allocation3 + $0x2c0] sm:$0xff] }
  0x31   :  { %1047 = vmatpush3.bf16.msra.mxu1 %v1046_v47  ;;  %v318_v47 = vlaneseq  ;;  %v570_v37 = vld [vmem:[#allocation3 + $0x2c8] sm:$0xff] }
  0x32   :  { %1048 = vmatprep.subr.bf16.mxu1 %v1207_v0 }
  0x33   :  { %1026 = vmatpush3.bf16.msra.mxu0 %v1025_v40  ;;  %v319_v48 = vand.u32 127, %v318_v47  ;;  %v325_v55 = vshrl.u32 %v318_v47, 7 }
  0x34   :  { %1051 = vmatprep.subr.bf16.mxu0 %v1207_v0 }
  0x35   :  { %1050 = vmatpush3.bf16.msra.mxu1 %v1049_v50  ;;  %vm320_vm1 = vcmp.lt.s32.totalorder %v319_v48, 16  ;;  %vm321_vm2 = vcmp.ge.s32.totalorder %v319_v48, 16  ;;  %vm322_vm3 = vcmp.lt.s32.totalorder %v319_v48, 32  ;;  %vm329_vm4 = vcmp.lt.s32.totalorder %v325_v55, 2  ;;  %v574_v55 = vld [vmem:[#allocation3 + $0x2e8] sm:$0xff] }
  0x36   :  { %826 = vmatmul.mubr.f32.vlgmr.msra.gmra.mrb[0].mxu0 %v32_v41  ;;  %1075 = vmatprep.subr.bf16.mxu1 %v1207_v0  ;;  %vm323_vm5 = vmand %vm321_vm2, %vm322_vm3 }
  0x37   :  { %895 = vmatprep.mubr.msk.f32.mxu0 %vm1208_vm0, %v1209_v1  ;;  %1053 = vmatpush3.bf16.msra.mxu0 %v1052_v54  ;;  %vm336_vm6 = vmand %vm320_vm1, %vm329_vm4 }
  0x38   :  { %1054 = vmatprep.subr.bf16.mxu0 %v1207_v0  ;;  %vm330_vm7 = vmand %vm323_vm5, %vm329_vm4 }
  0x3b   :  { %1056 = vmatpush3.bf16.msra.mxu0 %v1055_v56 }
  0x3c   :  { %1057 = vmatprep.subr.bf16.mxu0 %v1207_v0 }
  0x3f   :  { %1059 = vmatpush3.bf16.msra.mxu0 %v1058_v59 }
  0x40   :  { %1060 = vmatprep.subr.bf16.mxu0 %v1207_v0 }
  0x43   :  { %1062 = vmatpush3.bf16.msra.mxu0 %v1061_v62 }
  0x44   :  { %1063 = vmatprep.subr.bf16.mxu0 %v1207_v0 }
  0x47   :  { %1065 = vmatpush3.bf16.msra.mxu0 %v1064_v3  ;;  %v1100_v3 = vpack.c.bf16 %v466_v2, %v465_v63 }
  0x48   :  { %1066 = vmatprep.subr.bf16.mxu0 %v1207_v0 }
  0x4b   :  { %1068 = vmatpush3.bf16.msra.mxu0 %v1067_v11  ;;  %v1109_v11 = vpack.c.bf16 %v472_v10, %v471_v9 }
  0x4c   :  { %1069 = vmatprep.subr.bf16.mxu0 %v1207_v0 }
  0x4f   :  { %1071 = vmatpush3.bf16.msra.mxu0 %v1070_v14  ;;  %v1112_v14 = vpack.c.bf16 %v474_v13, %v473_v12 }
  0x50   :  { %1072 = vmatprep.subr.bf16.mxu0 %v1207_v0 }
  0x53   :  { %1074 = vmatpush3.bf16.msra.mxu0 %v1073_v17  ;;  %v1115_v17 = vpack.c.bf16 %v476_v16, %v475_v15 }
  0x54   :  { %1099 = vmatprep.subr.bf16.mxu0 %v1207_v0 }
 0x109   :  { %v122_v5 = vpop.f32.mrb[0].mxu0 }
 0x10a   :  { %v123_v6 = vadd.f32 %v679_v4, %v122_v5  ;;  %v827_v7 = vpop.f32.mrb[1].mxu0  ;;  %v468_v4 = vld [vmem:[#allocation3 + $0x218] sm:$0xff] }
 0x10b   :  { %v470_v7 = vld [vmem:[#allocation3 + $0x228] sm:$0xff] }
 0x10c   :  { %1156 = vtanh.f32 %v123_v6  ;;  %v469_v6 = vld [vmem:[#allocation3 + $0x220] sm:$0xff] }
 0x116   :  { %v1157_v8 = vpop.eup %1156 }
 0x117   :  { %861 = vmatmul.mubr.f32.vlgmr.msra.gmra.mrb[0].mxu1 %v1157_v8  ;;  %v1106_v8 = vpack.c.bf16 %v470_v7, %v469_v6 }
 0x118   :  { %930 = vmatprep.mubr.msk.f32.mxu1 %vm1208_vm0, %v1209_v1  ;;  %1077 = vmatpush3.bf16.msra.mxu1 %v1076_v21  ;;  %v479_v21 = vld [vmem:[#allocation3 + $0x270] sm:$0xff] }
 0x119   :  { %1078 = vmatprep.subr.bf16.mxu1 %v1207_v0 }
 0x11c   :  { %1080 = vmatpush3.bf16.msra.mxu1 %v1079_v23  ;;  %v1121_v23 = vpack.c.bf16 %v480_v22, %v479_v21 }
 0x11d   :  { %1081 = vmatprep.subr.bf16.mxu1 %v1207_v0 }
 0x120   :  { %1083 = vmatpush3.bf16.msra.mxu1 %v1082_v26  ;;  %v563_v26 = vld [vmem:[#allocation3 + $0x290] sm:$0xff] }
 0x121   :  { %1084 = vmatprep.subr.bf16.mxu1 %v1207_v0 }
 0x124   :  { %1086 = vmatpush3.bf16.msra.mxu1 %v1085_v29  ;;  %v1127_v29 = vpack.c.bf16 %v564_v28, %v563_v26 }
 0x125   :  { %1087 = vmatprep.subr.bf16.mxu1 %v1207_v0 }
 0x128   :  { %1089 = vmatpush3.bf16.msra.mxu1 %v1088_v32  ;;  %v1130_v32 = vpack.c.bf16 %v566_v31, %v565_v30 }
 0x129   :  { %1090 = vmatprep.subr.bf16.mxu1 %v1207_v0 }
 0x12c   :  { %1092 = vmatpush3.bf16.msra.mxu1 %v1091_v35  ;;  %v1133_v35 = vpack.c.bf16 %v568_v34, %v567_v33 }
 0x12d   :  { %1093 = vmatprep.subr.bf16.mxu1 %v1207_v0 }
 0x130   :  { %1095 = vmatpush3.bf16.msra.mxu1 %v1094_v38  ;;  %v1136_v38 = vpack.c.bf16 %v570_v37, %v569_v36 }
 0x131   :  { %1096 = vmatprep.subr.bf16.mxu1 %v1207_v0 }
 0x134   :  { %1098 = vmatpush3.bf16.msra.mxu1 %v1097_v46  ;;  %v685_v46 = vld [vmem:[%s1357_s2 + $0x3] ss:$0 sm:$0xff] }
 0x135   :  { %1123 = vmatprep.subr.bf16.mxu1 %v1207_v0 }
 0x1ea   :  { %v218_v40 = vpop.f32.mrb[0].mxu1 }
 0x1eb   :  { %v219_v41 = vadd.f32 %v681_v39, %v218_v40  ;;  %v862_v42 = vpop.f32.mrb[1].mxu1 }
 0x1ed   :  { %1158 = vtanh.f32 %v219_v41 }
 0x1f7   :  { %v1159_v43 = vpop.eup %1158 }
 0x1f8   :  { %896 = vmatmul.mubr.f32.vlgmr.msra.gmra.mrb[2].mxu0 %v1159_v43 }
 0x1f9   :  { %965 = vmatprep.mubr.msk.f32.mxu0 %vm1208_vm0, %v1209_v1  ;;  %1101 = vmatpush3.bf16.msra.mxu0 %v1100_v3 }
 0x1fa   :  { %1102 = vmatprep.subr.bf16.mxu0 %v1207_v0 }
 0x2cb   :  { %v314_v50 = vpop.f32.mrb[2].mxu0 }
 0x2cc   :  { %v315_v51 = vadd.f32 %v683_v49, %v314_v50  ;;  %v897_v52 = vpop.f32.mrb[3].mxu0 }
 0x2cd   :  { %v572_v52 = vld [vmem:[#allocation3 + $0x2d8] sm:$0xff] }
 0x2ce   :  { %v332_v53 = vmul.f32 1.442695, %v315_v51  ;;  %v366_v54 = vsel %vm320_vm1, %v315_v51, 0.0  ;;  %931 = vmatmul.mubr.msk.f32.vlgmr.msra.gmra.mrb[2].mxu1 %vm320_vm1, %v315_v51  ;;  %v331_v56 = vadd.f32 1.0, %v315_v51  ;;  %v337_v57 = vmul.f32 %v315_v51, %v315_v51  ;;  %v571_v51 = vld [vmem:[#allocation3 + $0x2d0] sm:$0xff] }
 0x2cf   :  { %367 = vst [vmem:[%s1359_s4] sm:$0xff] %v366_v54  ;;  %1000 = vmatprep.mubr.msk.f32.mxu1 %vm1208_vm0, %v1209_v1  ;;  %v467_v1 = vld [vmem:[#allocation3 + $0x210] sm:$0xff]  ;;  %1125 = vmatpush3.bf16.msra.mxu1 %v1124_v27  ;;  %v573_v54 = vld [vmem:[#allocation3 + $0x2e0] sm:$0xff] }
 0x2d0   :  { %1160 = vpow2.f32 %v332_v53  ;;  %v338_v61 = vsel %vm336_vm6, %v337_v57, 0.0  ;;  %v1103_v5 = vpack.c.bf16 %v468_v4, %v467_v1  ;;  %1126 = vmatprep.subr.bf16.mxu1 %v1207_v0  ;;  %v1139_v53 = vpack.c.bf16 %v572_v52, %v571_v51  ;;  %v575_v57 = vld [vmem:[#allocation3 + $0x2f0] sm:$0xff] }
 0x2d2   :  { %1104 = vmatpush3.bf16.msra.mxu0 %v1103_v5 }
 0x2d3   :  { %1105 = vmatprep.subr.bf16.mxu0 %v1207_v0  ;;  %1128 = vmatpush3.bf16.msra.mxu1 %v1127_v29 }
 0x2d4   :  { %1129 = vmatprep.subr.bf16.mxu1 %v1207_v0 }
 0x2d6   :  { %1107 = vmatpush3.bf16.msra.mxu0 %v1106_v8 }
 0x2d7   :  { %1108 = vmatprep.subr.bf16.mxu0 %v1207_v0  ;;  %1131 = vmatpush3.bf16.msra.mxu1 %v1130_v32 }
 0x2d8   :  { %1132 = vmatprep.subr.bf16.mxu1 %v1207_v0 }
 0x2da   :  { %v1161_v58 = vpop.eup %1160  ;;  %1110 = vmatpush3.bf16.msra.mxu0 %v1109_v11 }
 0x2db   :  { %v334_v59 = vsub.f32 %v331_v56, %v1161_v58  ;;  %1111 = vmatprep.subr.bf16.mxu0 %v1207_v0  ;;  %1134 = vmatpush3.bf16.msra.mxu1 %v1133_v35  ;;  %v1142_v56 = vpack.c.bf16 %v574_v55, %v573_v54  ;;  %v576_v58 = vld [vmem:[#allocation3 + $0x2f8] sm:$0xff] }
 0x2dc   :  { %1135 = vmatprep.subr.bf16.mxu1 %v1207_v0 }
 0x2dd   :  { %v335_v60 = vsel %vm330_vm7, %v334_v59, 0.0  ;;  %v1145_v59 = vpack.c.bf16 %v576_v58, %v575_v57 }
 0x2de   :  { %v339_v62 = vsub.f32 %v335_v60, %v338_v61  ;;  %1113 = vmatpush3.bf16.msra.mxu0 %v1112_v14  ;;  %v688_v60 = vld [vmem:[%s1357_s2 + $0x4] ss:$0 sm:$0xff] }
 0x2df   :  { %1114 = vmatprep.subr.bf16.mxu0 %v1207_v0  ;;  %1137 = vmatpush3.bf16.msra.mxu1 %v1136_v38 }
 0x2e0   :  { %340 = vadd.xlane.f32.xlu0 %v339_v62  ;;  %1138 = vmatprep.subr.bf16.mxu1 %v1207_v0 }
 0x2e2   :  { %1116 = vmatpush3.bf16.msra.mxu0 %v1115_v17 }
 0x2e3   :  { %1117 = vmatprep.subr.bf16.mxu0 %v1207_v0  ;;  %1140 = vmatpush3.bf16.msra.mxu1 %v1139_v53 }
 0x2e4   :  { %1141 = vmatprep.subr.bf16.mxu1 %v1207_v0 }
 0x2e6   :  { %1119 = vmatpush3.bf16.msra.mxu0 %v1118_v20 }
 0x2e7   :  { %1120 = vmatprep.subr.bf16.mxu0 %v1207_v0  ;;  %1143 = vmatpush3.bf16.msra.mxu1 %v1142_v56 }
 0x2e8   :  { %1144 = vmatprep.subr.bf16.mxu1 %v1207_v0 }
 0x2ea   :  { %1122 = vmatpush3.bf16.msra.mxu0 %v1121_v23 }
 0x2eb   :  { %1146 = vmatpush3.bf16.msra.mxu1 %v1145_v59 }
 0x36d   :  { %v341_v39 = vpop.xlane.xlu0 %340 }
 0x36e   :  { %v342_v40 = vrot.slane %v341_v39, 4 }
 0x370   :  { %v343_v41 = vadd.f32 %v342_v40, %v341_v39 }
 0x372   :  { %v344_v42 = vrot.slane %v343_v41, 2 }
 0x374   :  { %v345_v43 = vadd.f32 %v344_v42, %v343_v41 }
 0x376   :  { %v346_v44 = vrot.slane %v345_v43, 1 }
 0x378   :  { %v347_v45 = vadd.f32 %v346_v44, %v345_v43 }
 0x37a   :  { %1147 = vpush %v347_v45 }
 0x3a1   :  { %v459_v47 = vpop.f32.mrb[2].mxu1 }
 0x3a2   :  { %v460_v48 = vadd.f32 %v685_v46, %v459_v47  ;;  %v932_v49 = vpop.f32.mrb[3].mxu1 }
 0x3a4   :  { %1162 = vtanh.f32 %v460_v48 }
 0x3ab   :  { %s1148_s16 = spop %1147 }
 0x3ac   :  { %s349_s17 = smul.f32 -0.5, %s1148_s16 }
 0x3ae   :  { %v1163_v50 = vpop.eup %1162  ;;  %365 = sst [smem:[#allocation6]] %s349_s17 }
 0x3af   :  { %966 = vmatmul.mubr.f32.vlgmr.msra.gmra.mrb[4].mxu0 %v1163_v50 }
 0x482   :  { %v555_v61 = vpop.f32.mrb[4].mxu0 }
 0x483   :  { %v556_v62 = vadd.f32 %v688_v60, %v555_v61  ;;  %v967_v63 = vpop.f32.mrb[5].mxu0 }
 0x485   :  { %1164 = vtanh.f32 %v556_v62 }
 0x48f   :  { %v1165_v2 = vpop.eup %1164 }
 0x490   :  { %1001 = vmatmul.mubr.f32.vlgmr.msra.gmra.mrb[4].mxu1 %v1165_v2 }
 0x491   :  { %1199 = shalt.err (!%p1196_p10)
}
 0x492   :  { %s1210_s27 = smov [#allocation6]   ;;  %v690_v0 = vld [vmem:[%s1357_s2 + $0x5] ss:$0 sm:$0xff] }
 0x493   :  { %668 = dma.smem_to_hbm %s1210_s27, 16, %s1360_s5, [#allocation5]  }
 0x563   :  { %v651_v1 = vpop.f32.mrb[4].mxu1 }
 0x564   :  { %v652_v3 = vadd.f32 %v690_v0, %v651_v1  ;;  %v1002_v4 = vpop.f32.mrb[5].mxu1 }
 0x566   :  { %1166 = vtanh.f32 %v652_v3 }
 0x570   :  { %v1167_v5 = vpop.eup %1166 }
 0x571   :  { %656 = vst [vmem:[%s1358_s3] sm:$0xff] %v1167_v5 }
 0x572   :  { %1202 = dma.done.wait [#allocation5], 16  }
 0x573   :  { %1203 = vsyncadd [#allocation5], 4294967280 }
 0x574   :  { %676 = sfence }
 0x575   :  { %677 = vsyncpa [#allocation4], 1 }
 0x576   :  { %678 = vsyncpa [#allocation5], 1 }

</bundles_post_ra>
